<compile_context>
chip_gen: v7x
topology: tpu7x:2x2x1
jax: 0.10.0
libtpu: 0.0.40
codegen_flags: <defaults>
</compile_context>

<pallas_src>
import functools

import jax
import jax.numpy as jnp
from jax.experimental import pallas as pl
from jax.experimental.pallas import tpu as pltpu

LAT_INIT_SCALE = 1e-10

# Rows packed per lane-dense group: 64 rows * 2 output cols = 128 lanes.
PACK = 64

# Default packed-groups per grid step. 512 groups = 32768 original rows/step,
# ~4.7 MiB of streamed input per step: far above the ~1 MiB needed to reach
# ~85%+ of HBM roofline, and ~12 MiB of VMEM after double buffering (fits the
# 32 MiB scoped default on every generation, incl. v7x's 64 MiB part).
DEFAULT_TILE_GROUPS = 512

# Below this row count a plain XLA fusion beats kernel launch + DMA setup.
DEFAULT_MIN_PALLAS_ROWS = 4096

# Budget for streamed double-buffers + resident weights; kept below the 32 MiB
# scoped-VMEM default so no vmem_limit_bytes override is required anywhere.
VMEM_BUDGET_BYTES = 20 * 1024 * 1024


def _cell_cycle_packed_kernel(lat_ref, wlat_ref, bat_ref, wbat_ref, cst_ref,
                              out_ref):
    # Two lane-dense MXU matmuls against VMEM-resident block-diagonal weights
    # plus a broadcast bias add. The kernel is HBM-bound (~1 flop/byte of
    # useful work); all vector/MXU work hides under the DMA stream.
    acc = jnp.dot(lat_ref[...], wlat_ref[...],
                  preferred_element_type=jnp.float32)
    acc = acc + jnp.dot(bat_ref[...], wbat_ref[...],
                        preferred_element_type=jnp.float32)
    # cst_ref is (1, 128) = const tiled over the 64 packed rows -> broadcasts
    # over the tile, matching const.expand(N, -1).
    out_ref[...] = (acc + cst_ref[...]).astype(out_ref.dtype)


def _round_up(x, m):
    return ((x + m - 1) // m) * m


@functools.partial(jax.jit, static_argnames=("tile_groups", "min_pallas_rows"))
def cell_cycle_mean_linear_forward(lat_coord, lat_coef, const, batch_mat,
                                   batch_coef, *,
                                   tile_groups=DEFAULT_TILE_GROUPS,
                                   min_pallas_rows=DEFAULT_MIN_PALLAS_ROWS):
    n, ndim_lat = lat_coord.shape
    n_batch = batch_mat.shape[1]
    n_out = const.shape[-1]  # 2 for this module

    lat_coord = lat_coord.astype(jnp.float32)
    batch_mat = batch_mat.astype(jnp.float32)
    lat_coef = lat_coef.astype(jnp.float32)
    const = const.astype(jnp.float32).reshape(1, n_out)
    batch_coef = batch_coef.astype(jnp.float32)

    # Small-N fallback: launch + DMA overhead dominates, plain XLA is faster.
    if n < min_pallas_rows:
        return lat_coord @ lat_coef + const + batch_mat @ batch_coef

    pack = PACK  # 64 rows -> 128-lane-dense packed output row

    # Pad N up to a multiple of the packing factor ONLY (not to a tile
    # boundary). This copy happens only when N % 64 != 0; it is what keeps the
    # packing reshapes below free bitcasts. Grid-level raggedness is handled by
    # pl.cdiv + the pipeline's partial-block handling, with no padding at all.
    n_pad = _round_up(n, pack)
    if n_pad != n:
        pad = n_pad - n
        lat_coord = jnp.pad(lat_coord, ((0, pad), (0, 0)))
        batch_mat = jnp.pad(batch_mat, ((0, pad), (0, 0)))

    n_groups = n_pad // pack
    gl = pack * ndim_lat          # packed lat row width   (e.g. 2048)
    gb = pack * n_batch           # packed batch row width (e.g. 256)
    go = pack * n_out             # packed output width    (128)

    # Free row-major reshapes (pure bitcasts): pack 64 rows per packed row.
    lat_p = lat_coord.reshape(n_groups, gl)
    bat_p = batch_mat.reshape(n_groups, gb)

    # Block-diagonal replicated coefficients, built once at trace time, so the
    # packed matmuls emit a lane-dense (n_groups, 128) slab directly:
    #   w_lat[r*ndim_lat + k, 2*r + c] = lat_coef[k, c]   (zero elsewhere)
    eye = jnp.eye(pack, dtype=jnp.float32)
    w_lat = jnp.kron(eye, lat_coef)        # (gl, go)
    w_bat = jnp.kron(eye, batch_coef)      # (gb, go)
    const_p = jnp.tile(const, (1, pack))   # (1, go)

    # Tile the packed-group axis; keep double-buffered streamed blocks plus the
    # VMEM-resident weights under the scoped-VMEM budget on all generations.
    bytes_per_group = 4 * (gl + gb + go)
    weight_bytes = 4 * (gl + gb + 1) * go * 2   # conservative (double-buffered)
    max_tile = max(8, (VMEM_BUDGET_BYTES - weight_bytes) // (2 * bytes_per_group))
    tile_g = max(1, min(int(tile_groups), int(max_tile)))
    if tile_g < n_groups:
        tile_g = max(8, (tile_g // 8) * 8)  # sublane multiple when not full-dim
    tile_g = min(tile_g, n_groups)

    grid = (pl.cdiv(n_groups, tile_g),)

    cost = pl.CostEstimate(
        flops=2 * n_groups * go * (gl + gb),
        transcendentals=0,
        bytes_accessed=4 * (n_groups * (gl + gb + go) + (gl + gb + 1) * go),
    )

    out_p = pl.pallas_call(
        _cell_cycle_packed_kernel,
        out_shape=jax.ShapeDtypeStruct((n_groups, go), jnp.float32),
        grid_spec=pltpu.PrefetchScalarGridSpec(
            num_scalar_prefetch=0,
            grid=grid,
            in_specs=[
                # Streamed, lane-dense per-tile inputs (pipelined over groups).
                pl.BlockSpec((tile_g, gl), lambda i: (i, 0)),
                # Tiny parameters: constant block index -> VMEM-resident.
                pl.BlockSpec((gl, go), lambda i: (0, 0)),
                pl.BlockSpec((tile_g, gb), lambda i: (i, 0)),
                pl.BlockSpec((gb, go), lambda i: (0, 0)),
                pl.BlockSpec((1, go), lambda i: (0, 0)),
            ],
            out_specs=pl.BlockSpec((tile_g, go), lambda i: (i, 0)),
        ),
        compiler_params=pltpu.CompilerParams(
            dimension_semantics=("parallel",),  # shards groups across v7x's 2 TCs
        ),
        cost_estimate=cost,
    )(lat_p, w_lat, bat_p, w_bat, const_p)

    out = out_p.reshape(n_pad, n_out)   # free row-major reshape back to (N, 2)
    if n_pad != n:
        out = out[:n]                   # cheap: only 8 B/row of output
    return out


def reference_forward(lat_coord, lat_coef, const, batch_mat, batch_coef):
    return lat_coord @ lat_coef + const + batch_mat @ batch_coef


if __name__ == "__main__":
    key = jax.random.PRNGKey(0)
    k1, k2, k3, k4, k5, k6, k7, k8 = jax.random.split(key, 8)

    ndim_lat = 32
    n_batch = 4

    # O(1)-scale parameters for a meaningful numerical check (the module's own
    # init is randn * 1e-10 / zeros, which would make any comparison trivial).
    lat_coef = jax.random.normal(k1, (ndim_lat, 2), dtype=jnp.float32)
    const = jax.random.normal(k2, (1, 2), dtype=jnp.float32)
    batch_coef = jax.random.normal(k3, (n_batch, 2), dtype=jnp.float32)

    def make_inputs(kx, ky, n_cells):
        lat = jax.random.normal(kx, (n_cells, ndim_lat), dtype=jnp.float32)
        ids = jax.random.randint(ky, (n_cells,), 0, n_batch)
        bm = jax.nn.one_hot(ids, n_batch, dtype=jnp.float32)
        return lat, bm

    # --- Case 1: N divisible by 64 -> fully zero-copy packing, single tile ---
    lat_coord, batch_mat = make_inputs(k4, k5, 1024)
    out = cell_cycle_mean_linear_forward(
        lat_coord, lat_coef, const, batch_mat, batch_coef, min_pallas_rows=0)
    out = jax.block_until_ready(out)
    ref = reference_forward(lat_coord, lat_coef, const, batch_mat, batch_coef)
    assert out.shape == (1024, 2)
    assert jnp.allclose(out, ref, atol=1e-5, rtol=1e-5)

    # --- Case 2: ragged N (pads to 64-multiple) + multi-step grid with a
    #             ragged final grid block (15 of tile_groups=8... -> partial) ---
    lat_coord, batch_mat = make_inputs(k6, k7, 900)   # pads to 960 -> 15 groups
    out = cell_cycle_mean_linear_forward(
        lat_coord, lat_coef, const, batch_mat, batch_coef,
        tile_groups=8, min_pallas_rows=0)
    out = jax.block_until_ready(out)
    ref = reference_forward(lat_coord, lat_coef, const, batch_mat, batch_coef)
    assert out.shape == (900, 2)
    assert jnp.allclose(out, ref, atol=1e-5, rtol=1e-5)

    # --- Case 3: tiny N (< one packed group) ---
    lat_coord, batch_mat = make_inputs(k8, k5, 16)
    out = cell_cycle_mean_linear_forward(
        lat_coord, lat_coef, const, batch_mat, batch_coef, min_pallas_rows=0)
    out = jax.block_until_ready(out)
    ref = reference_forward(lat_coord, lat_coef, const, batch_mat, batch_coef)
    assert out.shape == (16, 2)
    assert jnp.allclose(out, ref, atol=1e-5, rtol=1e-5)

    print("KERNEL_OK")
</pallas_src>

<mosaic_0001>
module attributes {stable_mosaic.version = 11 : i64} {
  func.func @_cell_cycle_packed_kernel(%arg0: i32, %arg1: memref<16x2048xf32, #tpu.memory_space<vmem>>, %arg2: memref<2048x128xf32, #tpu.memory_space<vmem>>, %arg3: memref<16x256xf32, #tpu.memory_space<vmem>>, %arg4: memref<256x128xf32, #tpu.memory_space<vmem>>, %arg5: memref<1x128xf32, #tpu.memory_space<vmem>>, %arg6: memref<16x128xf32, #tpu.memory_space<vmem>>) attributes {dimension_semantics = [#tpu.dimension_semantics<parallel>], iteration_bounds = array<i64: 1>, scalar_prefetch = 0 : i64, scratch_operands = 0 : i64, tpu.core_type = #tpu.core_type<tc>, window_params = [{transform_indices = @transform_0, window_bounds = array<i64: 16, 2048>}, {pipeline_mode = #tpu.pipeline_mode<synchronous>, transform_indices = @transform_1, window_bounds = array<i64: 2048, 128>}, {transform_indices = @transform_2, window_bounds = array<i64: 16, 256>}, {pipeline_mode = #tpu.pipeline_mode<synchronous>, transform_indices = @transform_3, window_bounds = array<i64: 256, 128>}, {pipeline_mode = #tpu.pipeline_mode<synchronous>, transform_indices = @transform_4, window_bounds = array<i64: 1, 128>}, {transform_indices = @transform_5, window_bounds = array<i64: 16, 128>}]} {
    %c0 = arith.constant 0 : index
    %c0_0 = arith.constant 0 : index
    %0 = vector.load %arg1[%c0, %c0_0] : memref<16x2048xf32, #tpu.memory_space<vmem>>, vector<16x2048xf32>
    %c0_1 = arith.constant 0 : index
    %c0_2 = arith.constant 0 : index
    %1 = vector.load %arg2[%c0_1, %c0_2] : memref<2048x128xf32, #tpu.memory_space<vmem>>, vector<2048x128xf32>
    %cst = arith.constant dense<0.000000e+00> : vector<16x128xf32>
    %2 = tpu.matmul %0, %1, %cst {dimension_numbers = #tpu.dot_dimension_numbers<[1], [0], [0], [1], [0, 0, 1, 1], [], []>} : vector<16x2048xf32>, vector<2048x128xf32>, vector<16x128xf32> -> vector<16x128xf32>
    %c0_3 = arith.constant 0 : index
    %c0_4 = arith.constant 0 : index
    %3 = vector.load %arg3[%c0_3, %c0_4] : memref<16x256xf32, #tpu.memory_space<vmem>>, vector<16x256xf32>
    %c0_5 = arith.constant 0 : index
    %c0_6 = arith.constant 0 : index
    %4 = vector.load %arg4[%c0_5, %c0_6] : memref<256x128xf32, #tpu.memory_space<vmem>>, vector<256x128xf32>
    %cst_7 = arith.constant dense<0.000000e+00> : vector<16x128xf32>
    %5 = tpu.matmul %3, %4, %cst_7 {dimension_numbers = #tpu.dot_dimension_numbers<[1], [0], [0], [1], [0, 0, 1, 1], [], []>} : vector<16x256xf32>, vector<256x128xf32>, vector<16x128xf32> -> vector<16x128xf32>
    %6 = arith.addf %2, %5 : vector<16x128xf32>
    %c0_8 = arith.constant 0 : index
    %c0_9 = arith.constant 0 : index
    %7 = vector.load %arg5[%c0_8, %c0_9] : memref<1x128xf32, #tpu.memory_space<vmem>>, vector<1x128xf32>
    %8 = vector.broadcast %7 : vector<1x128xf32> to vector<16x128xf32>
    %9 = arith.addf %6, %8 : vector<16x128xf32>
    %c0_10 = arith.constant 0 : index
    %c0_11 = arith.constant 0 : index
    %10 = vector.load %arg6[%c0_10, %c0_11] : memref<16x128xf32, #tpu.memory_space<vmem>>, vector<16x128xf32>
    tpu.vector_store %arg6[%c0_10, %c0_11], %9 {strides = array<i32>} : memref<16x128xf32, #tpu.memory_space<vmem>>, vector<16x128xf32>,
    return
  }
  func.func @transform_0(%arg0: i32) -> (i32, i32) {
    %c0_i32 = arith.constant 0 : i32
    %c0_i32_0 = arith.constant 0 : i32
    return %arg0, %c0_i32 : i32, i32
  }
  func.func @transform_1(%arg0: i32) -> (i32, i32) {
    %c0_i32 = arith.constant 0 : i32
    %c0_i32_0 = arith.constant 0 : i32
    %c0_i32_1 = arith.constant 0 : i32
    return %c0_i32, %c0_i32_0 : i32, i32
  }
  func.func @transform_2(%arg0: i32) -> (i32, i32) {
    %c0_i32 = arith.constant 0 : i32
    %c0_i32_0 = arith.constant 0 : i32
    return %arg0, %c0_i32 : i32, i32
  }
  func.func @transform_3(%arg0: i32) -> (i32, i32) {
    %c0_i32 = arith.constant 0 : i32
    %c0_i32_0 = arith.constant 0 : i32
    %c0_i32_1 = arith.constant 0 : i32
    return %c0_i32, %c0_i32_0 : i32, i32
  }
  func.func @transform_4(%arg0: i32) -> (i32, i32) {
    %c0_i32 = arith.constant 0 : i32
    %c0_i32_0 = arith.constant 0 : i32
    %c0_i32_1 = arith.constant 0 : i32
    return %c0_i32, %c0_i32_0 : i32, i32
  }
  func.func @transform_5(%arg0: i32) -> (i32, i32) {
    %c0_i32 = arith.constant 0 : i32
    %c0_i32_0 = arith.constant 0 : i32
    return %arg0, %c0_i32 : i32, i32
  }
}

</mosaic_0001>

<bundles_post_ra>
// kernel: cell_cycle_mean_linear_forward.1
= control target key start
LH: loop header
LB: loop body
LE: loop exit
PB: predicated region body
PF: predicated region fallthrough
CT: control target
= control target key end

     0   :  { %s2692_s3 = inlined_call_operand.vmem [shape: f32[256,128], index: 3, kind: input, shape index: {}]   ;;  %s2693_s1 = inlined_call_operand.vmem [shape: f32[2048,128], index: 1, kind: input, shape index: {}]   ;;  %s2694_s2 = inlined_call_operand.vmem [shape: f32[16,256], index: 2, kind: input, shape index: {}]   ;;  %s2695_s0 = inlined_call_operand.vmem [shape: f32[16,2048], index: 0, kind: input, shape index: {}]   ;;  %s2696_s4 = inlined_call_operand.vmem [shape: f32[1,128], index: 4, kind: input, shape index: {}]   ;;  %s2697_s5 = inlined_call_operand.vmem [shape: f32[16,128], index: 5, kind: output, shape index: {}]  }
   0x1   :  { %v328_v0 = vld [vmem:[%s2692_s3 + $0x80] sm:$0xff]  ;;  %v329_v1 = vld [vmem:[%s2692_s3 + $0x88] sm:$0xff]  ;;  %v330_v11 = vld [vmem:[%s2692_s3 + $0x90] sm:$0xff] }
   0x2   :  { %v68_v2 = vld [vmem:[%s2693_s1 + $0x80] sm:$0xff]  ;;  %v1377_v3 = vpack.c.bf16 %v329_v1, %v328_v0  ;;  %v69_v4 = vld [vmem:[%s2693_s1 + $0x88] sm:$0xff]  ;;  %v331_v13 = vld [vmem:[%s2692_s3 + $0x98] sm:$0xff] }
   0x3   :  { %v312_v5 = vld [vmem:[%s2692_s3] sm:$0xff]  ;;  %v313_v6 = vld [vmem:[%s2692_s3 + $0x8] sm:$0xff]  ;;  %v1409_v7 = vpack.c.bf16 %v69_v4, %v68_v2  ;;  %v70_v14 = vld [vmem:[%s2693_s1 + $0x90] sm:$0xff]  ;;  %v1381_v16 = vpack.c.bf16 %v331_v13, %v330_v11 }
   0x4   :  { %v1379_v8 = vpack.c.bf16 %v313_v6, %v312_v5  ;;  %v52_v9 = vld [vmem:[%s2693_s1] sm:$0xff]  ;;  %v53_v10 = vld [vmem:[%s2693_s1 + $0x8] sm:$0xff]  ;;  %1378 = vmatprep.subr.bf16.mxu0 %v1377_v3  ;;  %v71_v15 = vld [vmem:[%s2693_s1 + $0x98] sm:$0xff] }
   0x5   :  { %v1411_v12 = vpack.c.bf16 %v53_v10, %v52_v9  ;;  %1410 = vmatprep.subr.bf16.mxu1 %v1409_v7  ;;  %v1413_v17 = vpack.c.bf16 %v71_v15, %v70_v14  ;;  %v314_v18 = vld [vmem:[%s2692_s3 + $0x10] sm:$0xff]  ;;  %v315_v19 = vld [vmem:[%s2692_s3 + $0x18] sm:$0xff]  ;;  %v332_v23 = vld [vmem:[%s2692_s3 + $0xa0] sm:$0xff] }
   0x6   :  { %1380 = vmatpush3.bf16.msra.mxu0 %v1379_v8  ;;  %v54_v20 = vld [vmem:[%s2693_s1 + $0x10] sm:$0xff]  ;;  %v1383_v21 = vpack.c.bf16 %v315_v19, %v314_v18  ;;  %v55_v22 = vld [vmem:[%s2693_s1 + $0x18] sm:$0xff]  ;;  %v333_v24 = vld [vmem:[%s2692_s3 + $0xa8] sm:$0xff] }
   0x7   :  { %1412 = vmatpush3.bf16.msra.mxu1 %v1411_v12  ;;  %1382 = vmatprep.subr.bf16.mxu0 %v1381_v16  ;;  %v1415_v25 = vpack.c.bf16 %v55_v22, %v54_v20  ;;  %v1385_v26 = vpack.c.bf16 %v333_v24, %v332_v23  ;;  %v72_v27 = vld [vmem:[%s2693_s1 + $0xa0] sm:$0xff]  ;;  %v73_v28 = vld [vmem:[%s2693_s1 + $0xa8] sm:$0xff]  ;;  %v334_v35 = vld [vmem:[%s2692_s3 + $0xb0] sm:$0xff] }
   0x8   :  { %1414 = vmatprep.subr.bf16.mxu1 %v1413_v17  ;;  %v316_v29 = vld [vmem:[%s2692_s3 + $0x20] sm:$0xff]  ;;  %v1417_v30 = vpack.c.bf16 %v73_v28, %v72_v27  ;;  %v317_v31 = vld [vmem:[%s2692_s3 + $0x28] sm:$0xff]  ;;  %v335_v36 = vld [vmem:[%s2692_s3 + $0xb8] sm:$0xff] }
   0x9   :  { %v56_v32 = vld [vmem:[%s2693_s1 + $0x20] sm:$0xff]  ;;  %v57_v33 = vld [vmem:[%s2693_s1 + $0x28] sm:$0xff]  ;;  %v1387_v34 = vpack.c.bf16 %v317_v31, %v316_v29  ;;  %v74_v37 = vld [vmem:[%s2693_s1 + $0xb0] sm:$0xff]  ;;  %v1389_v39 = vpack.c.bf16 %v335_v36, %v334_v35 }
   0xa   :  { %1384 = vmatpush3.bf16.msra.mxu0 %v1383_v21  ;;  %v1419_v38 = vpack.c.bf16 %v57_v33, %v56_v32  ;;  %v75_v40 = vld [vmem:[%s2693_s1 + $0xb8] sm:$0xff]  ;;  %v318_v41 = vld [vmem:[%s2692_s3 + $0x30] sm:$0xff]  ;;  %v336_v46 = vld [vmem:[%s2692_s3 + $0xc0] sm:$0xff] }
   0xb   :  { %1416 = vmatpush3.bf16.msra.mxu1 %v1415_v25  ;;  %1386 = vmatprep.subr.bf16.mxu0 %v1385_v26  ;;  %v319_v42 = vld [vmem:[%s2692_s3 + $0x38] sm:$0xff]  ;;  %v1421_v43 = vpack.c.bf16 %v75_v40, %v74_v37  ;;  %v58_v44 = vld [vmem:[%s2693_s1 + $0x30] sm:$0xff]  ;;  %v337_v47 = vld [vmem:[%s2692_s3 + $0xc8] sm:$0xff] }
   0xc   :  { %1418 = vmatprep.subr.bf16.mxu1 %v1417_v30  ;;  %v59_v45 = vld [vmem:[%s2693_s1 + $0x38] sm:$0xff]  ;;  %v76_v48 = vld [vmem:[%s2693_s1 + $0xc0] sm:$0xff]  ;;  %v77_v49 = vld [vmem:[%s2693_s1 + $0xc8] sm:$0xff]  ;;  %v1391_v50 = vpack.c.bf16 %v319_v42, %v318_v41  ;;  %v1393_v52 = vpack.c.bf16 %v337_v47, %v336_v46 }
   0xd   :  { %v1423_v51 = vpack.c.bf16 %v59_v45, %v58_v44  ;;  %v320_v53 = vld [vmem:[%s2692_s3 + $0x40] sm:$0xff]  ;;  %v321_v54 = vld [vmem:[%s2692_s3 + $0x48] sm:$0xff]  ;;  %v1425_v56 = vpack.c.bf16 %v77_v49, %v76_v48  ;;  %v338_v58 = vld [vmem:[%s2692_s3 + $0xd0] sm:$0xff] }
   0xe   :  { %1388 = vmatpush3.bf16.msra.mxu0 %v1387_v34  ;;  %v60_v55 = vld [vmem:[%s2693_s1 + $0x40] sm:$0xff]  ;;  %v61_v57 = vld [vmem:[%s2693_s1 + $0x48] sm:$0xff]  ;;  %v339_v59 = vld [vmem:[%s2692_s3 + $0xd8] sm:$0xff]  ;;  %v1395_v62 = vpack.c.bf16 %v321_v54, %v320_v53 }
   0xf   :  { %1420 = vmatpush3.bf16.msra.mxu1 %v1419_v38  ;;  %1390 = vmatprep.subr.bf16.mxu0 %v1389_v39  ;;  %v78_v60 = vld [vmem:[%s2693_s1 + $0xd0] sm:$0xff]  ;;  %v79_v61 = vld [vmem:[%s2693_s1 + $0xd8] sm:$0xff]  ;;  %v1427_v63 = vpack.c.bf16 %v61_v57, %v60_v55  ;;  %v1397_v0 = vpack.c.bf16 %v339_v59, %v338_v58  ;;  %v340_v6 = vld [vmem:[%s2692_s3 + $0xe0] sm:$0xff] }
  0x10   :  { %1422 = vmatprep.subr.bf16.mxu1 %v1421_v43  ;;  %v322_v1 = vld [vmem:[%s2692_s3 + $0x50] sm:$0xff]  ;;  %v323_v2 = vld [vmem:[%s2692_s3 + $0x58] sm:$0xff]  ;;  %v1429_v4 = vpack.c.bf16 %v79_v61, %v78_v60  ;;  %v341_v7 = vld [vmem:[%s2692_s3 + $0xe8] sm:$0xff] }
  0x11   :  { %v62_v3 = vld [vmem:[%s2693_s1 + $0x50] sm:$0xff]  ;;  %v63_v5 = vld [vmem:[%s2693_s1 + $0x58] sm:$0xff]  ;;  %v80_v8 = vld [vmem:[%s2693_s1 + $0xe0] sm:$0xff]  ;;  %v1399_v10 = vpack.c.bf16 %v323_v2, %v322_v1  ;;  %v1401_v14 = vpack.c.bf16 %v341_v7, %v340_v6 }
  0x12   :  { %1392 = vmatpush3.bf16.msra.mxu0 %v1391_v50  ;;  %v81_v9 = vld [vmem:[%s2693_s1 + $0xe8] sm:$0xff]  ;;  %v324_v11 = vld [vmem:[%s2692_s3 + $0x60] sm:$0xff]  ;;  %v1431_v13 = vpack.c.bf16 %v63_v5, %v62_v3  ;;  %v342_v20 = vld [vmem:[%s2692_s3 + $0xf0] sm:$0xff] }
  0x13   :  { %1424 = vmatpush3.bf16.msra.mxu1 %v1423_v51  ;;  %1394 = vmatprep.subr.bf16.mxu0 %v1393_v52  ;;  %v325_v12 = vld [vmem:[%s2692_s3 + $0x68] sm:$0xff]  ;;  %v64_v15 = vld [vmem:[%s2693_s1 + $0x60] sm:$0xff]  ;;  %v1433_v18 = vpack.c.bf16 %v81_v9, %v80_v8  ;;  %v343_v21 = vld [vmem:[%s2692_s3 + $0xf8] sm:$0xff] }
  0x14   :  { %1426 = vmatprep.subr.bf16.mxu1 %v1425_v56  ;;  %v309_v16 = vld [vmem:[%s2694_s2 + $0x8] sm:$0xff]  ;;  %v82_v22 = vld [vmem:[%s2693_s1 + $0xf0] sm:$0xff]  ;;  %v83_v23 = vld [vmem:[%s2693_s1 + $0xf8] sm:$0xff]  ;;  %v1403_v24 = vpack.c.bf16 %v325_v12, %v324_v11  ;;  %v1405_v26 = vpack.c.bf16 %v343_v21, %v342_v20 }
  0x15   :  { %v21_v17 = vld [vmem:[%s2695_s0 + $0x8] sm:$0xff]  ;;  %408 = vmatprep.mubr.f32.mxu0 %v309_v16  ;;  %v326_v27 = vld [vmem:[%s2692_s3 + $0x70] sm:$0xff]  ;;  %v327_v28 = vld [vmem:[%s2692_s3 + $0x78] sm:$0xff]  ;;  %v1437_v30 = vpack.c.bf16 %v83_v23, %v82_v22 }
  0x16   :  { %1396 = vmatpush3.bf16.msra.mxu0 %v1395_v62  ;;  %v65_v19 = vld [vmem:[%s2693_s1 + $0x68] sm:$0xff]  ;;  %483 = vmatprep.mubr.f32.mxu1 %v21_v17  ;;  %v66_v29 = vld [vmem:[%s2693_s1 + $0x70] sm:$0xff]  ;;  %v67_v31 = vld [vmem:[%s2693_s1 + $0x78] sm:$0xff]  ;;  %v1407_v36 = vpack.c.bf16 %v327_v28, %v326_v27 }
  0x17   :  { %1428 = vmatpush3.bf16.msra.mxu1 %v1427_v63  ;;  %1398 = vmatprep.subr.bf16.mxu0 %v1397_v0  ;;  %v1435_v25 = vpack.c.bf16 %v65_v19, %v64_v15  ;;  %v100_v32 = vld [vmem:[%s2693_s1 + $0x180] sm:$0xff]  ;;  %v101_v33 = vld [vmem:[%s2693_s1 + $0x188] sm:$0xff]  ;;  %v1439_v37 = vpack.c.bf16 %v67_v31, %v66_v29  ;;  %v102_v44 = vld [vmem:[%s2693_s1 + $0x190] sm:$0xff] }
  0x18   :  { %1430 = vmatprep.subr.bf16.mxu1 %v1429_v4  ;;  %v132_v34 = vld [vmem:[%s2693_s1 + $0x280] sm:$0xff]  ;;  %v133_v35 = vld [vmem:[%s2693_s1 + $0x288] sm:$0xff]  ;;  %v1441_v38 = vpack.c.bf16 %v101_v33, %v100_v32  ;;  %v103_v45 = vld [vmem:[%s2693_s1 + $0x198] sm:$0xff] }
  0x19   :  { %v84_v39 = vld [vmem:[%s2693_s1 + $0x100] sm:$0xff]  ;;  %v85_v40 = vld [vmem:[%s2693_s1 + $0x108] sm:$0xff]  ;;  %v1473_v42 = vpack.c.bf16 %v133_v35, %v132_v34  ;;  %v134_v46 = vld [vmem:[%s2693_s1 + $0x290] sm:$0xff]  ;;  %v1445_v52 = vpack.c.bf16 %v103_v45, %v102_v44 }
  0x1a   :  { %1400 = vmatpush3.bf16.msra.mxu0 %v1399_v10  ;;  %v116_v41 = vld [vmem:[%s2693_s1 + $0x200] sm:$0xff]  ;;  %v117_v43 = vld [vmem:[%s2693_s1 + $0x208] sm:$0xff]  ;;  %v135_v47 = vld [vmem:[%s2693_s1 + $0x298] sm:$0xff]  ;;  %v1443_v50 = vpack.c.bf16 %v85_v40, %v84_v39 }
  0x1b   :  { %1432 = vmatpush3.bf16.msra.mxu1 %v1431_v13  ;;  %1402 = vmatprep.subr.bf16.mxu0 %v1401_v14  ;;  %v308_v48 = vld [vmem:[%s2694_s2] sm:$0xff]  ;;  %v1475_v51 = vpack.c.bf16 %v117_v43, %v116_v41  ;;  %v86_v53 = vld [vmem:[%s2693_s1 + $0x110] sm:$0xff]  ;;  %v87_v54 = vld [vmem:[%s2693_s1 + $0x118] sm:$0xff]  ;;  %v1477_v56 = vpack.c.bf16 %v135_v47, %v134_v46 }
  0x1c   :  { %1434 = vmatprep.subr.bf16.mxu1 %v1433_v18  ;;  %v20_v49 = vld [vmem:[%s2695_s0] sm:$0xff]  ;;  %v118_v55 = vld [vmem:[%s2693_s1 + $0x210] sm:$0xff]  ;;  %v119_v57 = vld [vmem:[%s2693_s1 + $0x218] sm:$0xff]  ;;  %v1447_v62 = vpack.c.bf16 %v87_v54, %v86_v53 }
  0x1d   :  { %v104_v58 = vld [vmem:[%s2693_s1 + $0x1a0] sm:$0xff]  ;;  %v105_v59 = vld [vmem:[%s2693_s1 + $0x1a8] sm:$0xff]  ;;  %v1479_v63 = vpack.c.bf16 %v119_v57, %v118_v55  ;;  %v106_v6 = vld [vmem:[%s2693_s1 + $0x1b0] sm:$0xff] }
  0x1e   :  { %1404 = vmatpush3.bf16.msra.mxu0 %v1403_v24  ;;  %v136_v60 = vld [vmem:[%s2693_s1 + $0x2a0] sm:$0xff]  ;;  %v137_v61 = vld [vmem:[%s2693_s1 + $0x2a8] sm:$0xff]  ;;  %v1449_v0 = vpack.c.bf16 %v105_v59, %v104_v58  ;;  %v107_v7 = vld [vmem:[%s2693_s1 + $0x1b8] sm:$0xff] }
  0x1f   :  { %1436 = vmatpush3.bf16.msra.mxu1 %v1435_v25  ;;  %1406 = vmatprep.subr.bf16.mxu0 %v1405_v26  ;;  %v88_v1 = vld [vmem:[%s2693_s1 + $0x120] sm:$0xff]  ;;  %v89_v2 = vld [vmem:[%s2693_s1 + $0x128] sm:$0xff]  ;;  %v1481_v4 = vpack.c.bf16 %v137_v61, %v136_v60  ;;  %v138_v8 = vld [vmem:[%s2693_s1 + $0x2b0] sm:$0xff]  ;;  %v1453_v16 = vpack.c.bf16 %v107_v7, %v106_v6 }
  0x20   :  { %1438 = vmatprep.subr.bf16.mxu1 %v1437_v30  ;;  %v120_v3 = vld [vmem:[%s2693_s1 + $0x220] sm:$0xff]  ;;  %v121_v5 = vld [vmem:[%s2693_s1 + $0x228] sm:$0xff]  ;;  %v139_v9 = vld [vmem:[%s2693_s1 + $0x2b8] sm:$0xff]  ;;  %v1451_v11 = vpack.c.bf16 %v89_v2, %v88_v1 }
  0x21   :  { %v90_v10 = vld [vmem:[%s2693_s1 + $0x130] sm:$0xff]  ;;  %v91_v12 = vld [vmem:[%s2693_s1 + $0x138] sm:$0xff]  ;;  %v1483_v15 = vpack.c.bf16 %v121_v5, %v120_v3  ;;  %v108_v17 = vld [vmem:[%s2693_s1 + $0x1c0] sm:$0xff]  ;;  %v1485_v20 = vpack.c.bf16 %v139_v9, %v138_v8 }
  0x22   :  { %1408 = vmatpush3.bf16.msra.mxu0 %v1407_v36  ;;  %v122_v13 = vld [vmem:[%s2693_s1 + $0x230] sm:$0xff]  ;;  %v123_v14 = vld [vmem:[%s2693_s1 + $0x238] sm:$0xff]  ;;  %v37_v19 = vld [vmem:[%s2695_s0 + $0x88] sm:$0xff]  ;;  %v1455_v26 = vpack.c.bf16 %v91_v12, %v90_v10 }
  0x23   :  { %1440 = vmatpush3.bf16.msra.mxu1 %v1439_v37  ;;  %1442 = vmatprep.subr.bf16.mxu0 %v1441_v38  ;;  %v311_v18 = vld [vmem:[%s2694_s2 + $0x18] sm:$0xff]  ;;  %v109_v21 = vld [vmem:[%s2693_s1 + $0x1c8] sm:$0xff]  ;;  %v310_v22 = vld [vmem:[%s2694_s2 + $0x10] sm:$0xff]  ;;  %v1487_v29 = vpack.c.bf16 %v123_v14, %v122_v13 }
  0x24   :  { %1474 = vmatprep.subr.bf16.mxu1 %v1473_v42  ;;  %v36_v23 = vld [vmem:[%s2695_s0 + $0x80] sm:$0xff]  ;;  %v141_v25 = vld [vmem:[%s2693_s1 + $0x2c8] sm:$0xff]  ;;  %v1457_v30 = vpack.c.bf16 %v109_v21, %v108_v17  ;;  %v23_v32 = vld [vmem:[%s2695_s0 + $0x18] sm:$0xff] }
  0x25   :  { %409 = vmatmul.mubr.f32.vlgmr.msra.gmra.mrb[0].mxu0 %v308_v48  ;;  %v140_v24 = vld [vmem:[%s2693_s1 + $0x2c0] sm:$0xff]  ;;  %v93_v28 = vld [vmem:[%s2693_s1 + $0x148] sm:$0xff]  ;;  %v110_v36 = vld [vmem:[%s2693_s1 + $0x1d0] sm:$0xff] }
  0x26   :  { %484 = vmatmul.mubr.f32.vlgmr.msra.gmra.mrb[0].mxu1 %v20_v49  ;;  %1444 = vmatpush3.bf16.msra.mxu0 %v1443_v50  ;;  %v92_v27 = vld [vmem:[%s2693_s1 + $0x140] sm:$0xff]  ;;  %v25_v33 = vld [vmem:[%s2695_s0 + $0x28] sm:$0xff]  ;;  %v1489_v34 = vpack.c.bf16 %v141_v25, %v140_v24  ;;  %v111_v37 = vld [vmem:[%s2693_s1 + $0x1d8] sm:$0xff] }
  0x27   :  { %1476 = vmatpush3.bf16.msra.mxu1 %v1475_v51  ;;  %1446 = vmatprep.subr.bf16.mxu0 %v1445_v52  ;;  %v124_v31 = vld [vmem:[%s2693_s1 + $0x240] sm:$0xff]  ;;  %v125_v35 = vld [vmem:[%s2693_s1 + $0x248] sm:$0xff]  ;;  %v142_v38 = vld [vmem:[%s2693_s1 + $0x2d0] sm:$0xff]  ;;  %v1459_v40 = vpack.c.bf16 %v93_v28, %v92_v27  ;;  %v1461_v42 = vpack.c.bf16 %v111_v37, %v110_v36 }
  0x28   :  { %1478 = vmatprep.subr.bf16.mxu1 %v1477_v56  ;;  %413 = vmatprep.mubr.f32.mxu0 %v311_v18  ;;  %v143_v39 = vld [vmem:[%s2693_s1 + $0x2d8] sm:$0xff]  ;;  %v1491_v41 = vpack.c.bf16 %v125_v35, %v124_v31  ;;  %v94_v43 = vld [vmem:[%s2693_s1 + $0x150] sm:$0xff]  ;;  %v112_v48 = vld [vmem:[%s2693_s1 + $0x1e0] sm:$0xff] }
  0x29   :  { %488 = vmatprep.mubr.f32.mxu1 %v37_v19  ;;  %414 = vmatmul.mubr.f32.gmra.mrb[2].mxu0 %v310_v22  ;;  %v95_v44 = vld [vmem:[%s2693_s1 + $0x158] sm:$0xff]  ;;  %v126_v45 = vld [vmem:[%s2693_s1 + $0x250] sm:$0xff]  ;;  %v1493_v46 = vpack.c.bf16 %v143_v39, %v142_v38  ;;  %v113_v49 = vld [vmem:[%s2693_s1 + $0x1e8] sm:$0xff] }
  0x2a   :  { %1448 = vmatpush3.bf16.msra.mxu0 %v1447_v62  ;;  %489 = vmatmul.mubr.f32.gmra.mrb[2].mxu1 %v36_v23  ;;  %v127_v47 = vld [vmem:[%s2693_s1 + $0x258] sm:$0xff]  ;;  %v144_v50 = vld [vmem:[%s2693_s1 + $0x2e0] sm:$0xff]  ;;  %v145_v51 = vld [vmem:[%s2693_s1 + $0x2e8] sm:$0xff]  ;;  %v1463_v52 = vpack.c.bf16 %v95_v44, %v94_v43  ;;  %v1465_v54 = vpack.c.bf16 %v113_v49, %v112_v48 }
  0x2b   :  { %1480 = vmatpush3.bf16.msra.mxu1 %v1479_v63  ;;  %1450 = vmatprep.subr.bf16.mxu0 %v1449_v0  ;;  %v1495_v53 = vpack.c.bf16 %v127_v47, %v126_v45  ;;  %v96_v55 = vld [vmem:[%s2693_s1 + $0x160] sm:$0xff]  ;;  %v97_v56 = vld [vmem:[%s2693_s1 + $0x168] sm:$0xff]  ;;  %v1497_v58 = vpack.c.bf16 %v145_v51, %v144_v50  ;;  %v114_v60 = vld [vmem:[%s2693_s1 + $0x1f0] sm:$0xff] }
  0x2c   :  { %1482 = vmatprep.subr.bf16.mxu1 %v1481_v4  ;;  %558 = vmatprep.mubr.f32.mxu0 %v23_v32  ;;  %v128_v57 = vld [vmem:[%s2693_s1 + $0x260] sm:$0xff]  ;;  %v129_v59 = vld [vmem:[%s2693_s1 + $0x268] sm:$0xff]  ;;  %v115_v61 = vld [vmem:[%s2693_s1 + $0x1f8] sm:$0xff]  ;;  %v1467_v0 = vpack.c.bf16 %v97_v56, %v96_v55 }
  0x2d   :  { %633 = vmatprep.mubr.f32.mxu1 %v25_v33  ;;  %v146_v62 = vld [vmem:[%s2693_s1 + $0x2f0] sm:$0xff]  ;;  %v147_v63 = vld [vmem:[%s2693_s1 + $0x2f8] sm:$0xff]  ;;  %v1499_v1 = vpack.c.bf16 %v129_v59, %v128_v57  ;;  %v1469_v2 = vpack.c.bf16 %v115_v61, %v114_v60  ;;  %v164_v8 = vld [vmem:[%s2693_s1 + $0x380] sm:$0xff] }
  0x2e   :  { %1452 = vmatpush3.bf16.msra.mxu0 %v1451_v11  ;;  %v98_v3 = vld [vmem:[%s2693_s1 + $0x170] sm:$0xff]  ;;  %v99_v4 = vld [vmem:[%s2693_s1 + $0x178] sm:$0xff]  ;;  %v1501_v6 = vpack.c.bf16 %v147_v63, %v146_v62  ;;  %v165_v9 = vld [vmem:[%s2693_s1 + $0x388] sm:$0xff] }
  0x2f   :  { %1484 = vmatpush3.bf16.msra.mxu1 %v1483_v15  ;;  %1454 = vmatprep.subr.bf16.mxu0 %v1453_v16  ;;  %v130_v5 = vld [vmem:[%s2693_s1 + $0x270] sm:$0xff]  ;;  %v131_v7 = vld [vmem:[%s2693_s1 + $0x278] sm:$0xff]  ;;  %v196_v10 = vld [vmem:[%s2693_s1 + $0x480] sm:$0xff]  ;;  %v1471_v12 = vpack.c.bf16 %v99_v4, %v98_v3  ;;  %v1505_v14 = vpack.c.bf16 %v165_v9, %v164_v8 }
  0x30   :  { %1486 = vmatprep.subr.bf16.mxu1 %v1485_v20  ;;  %v197_v11 = vld [vmem:[%s2693_s1 + $0x488] sm:$0xff]  ;;  %v1503_v13 = vpack.c.bf16 %v131_v7, %v130_v5  ;;  %v148_v15 = vld [vmem:[%s2693_s1 + $0x300] sm:$0xff]  ;;  %v166_v20 = vld [vmem:[%s2693_s1 + $0x390] sm:$0xff] }
  0x31   :  { %v149_v16 = vld [vmem:[%s2693_s1 + $0x308] sm:$0xff]  ;;  %v1537_v17 = vpack.c.bf16 %v197_v11, %v196_v10  ;;  %v180_v18 = vld [vmem:[%s2693_s1 + $0x400] sm:$0xff]  ;;  %v167_v21 = vld [vmem:[%s2693_s1 + $0x398] sm:$0xff] }
  0x32   :  { %1456 = vmatpush3.bf16.msra.mxu0 %v1455_v26  ;;  %v181_v19 = vld [vmem:[%s2693_s1 + $0x408] sm:$0xff]  ;;  %v198_v22 = vld [vmem:[%s2693_s1 + $0x490] sm:$0xff]  ;;  %v199_v23 = vld [vmem:[%s2693_s1 + $0x498] sm:$0xff]  ;;  %v1507_v26 = vpack.c.bf16 %v149_v16, %v148_v15  ;;  %v1509_v32 = vpack.c.bf16 %v167_v21, %v166_v20 }
  0x33   :  { %1488 = vmatpush3.bf16.msra.mxu1 %v1487_v29  ;;  %1458 = vmatprep.subr.bf16.mxu0 %v1457_v30  ;;  %v22_v24 = vld [vmem:[%s2695_s0 + $0x10] sm:$0xff]  ;;  %v24_v25 = vld [vmem:[%s2695_s0 + $0x20] sm:$0xff]  ;;  %v39_v27 = vld [vmem:[%s2695_s0 + $0x98] sm:$0xff]  ;;  %v1539_v28 = vpack.c.bf16 %v181_v19, %v180_v18  ;;  %v1541_v33 = vpack.c.bf16 %v199_v23, %v198_v22 }
  0x34   :  { %1490 = vmatprep.subr.bf16.mxu1 %v1489_v34  ;;  %v150_v29 = vld [vmem:[%s2693_s1 + $0x310] sm:$0xff]  ;;  %v151_v30 = vld [vmem:[%s2693_s1 + $0x318] sm:$0xff]  ;;  %v168_v35 = vld [vmem:[%s2693_s1 + $0x3a0] sm:$0xff] }
  0x35   :  { %v182_v31 = vld [vmem:[%s2693_s1 + $0x410] sm:$0xff]  ;;  %v183_v34 = vld [vmem:[%s2693_s1 + $0x418] sm:$0xff]  ;;  %v169_v36 = vld [vmem:[%s2693_s1 + $0x3a8] sm:$0xff] }
  0x36   :  { %1460 = vmatpush3.bf16.msra.mxu0 %v1459_v40  ;;  %v200_v37 = vld [vmem:[%s2693_s1 + $0x4a0] sm:$0xff]  ;;  %v201_v38 = vld [vmem:[%s2693_s1 + $0x4a8] sm:$0xff]  ;;  %v38_v39 = vld [vmem:[%s2695_s0 + $0x90] sm:$0xff]  ;;  %v1543_v43 = vpack.c.bf16 %v183_v34, %v182_v31  ;;  %v1513_v44 = vpack.c.bf16 %v169_v36, %v168_v35 }
  0x37   :  { %1492 = vmatpush3.bf16.msra.mxu1 %v1491_v41  ;;  %1462 = vmatprep.subr.bf16.mxu0 %v1461_v42  ;;  %v41_v40 = vld [vmem:[%s2695_s0 + $0xa8] sm:$0xff]  ;;  %v1511_v41 = vpack.c.bf16 %v151_v30, %v150_v29  ;;  %v40_v42 = vld [vmem:[%s2695_s0 + $0xa0] sm:$0xff]  ;;  %v1545_v48 = vpack.c.bf16 %v201_v38, %v200_v37  ;;  %v170_v50 = vld [vmem:[%s2693_s1 + $0x3b0] sm:$0xff] }
  0x38   :  { %1494 = vmatprep.subr.bf16.mxu1 %v1493_v46  ;;  %v152_v45 = vld [vmem:[%s2693_s1 + $0x320] sm:$0xff]  ;;  %v153_v46 = vld [vmem:[%s2693_s1 + $0x328] sm:$0xff]  ;;  %v171_v51 = vld [vmem:[%s2693_s1 + $0x3b8] sm:$0xff] }
  0x39   :  { %v184_v47 = vld [vmem:[%s2693_s1 + $0x420] sm:$0xff]  ;;  %v185_v49 = vld [vmem:[%s2693_s1 + $0x428] sm:$0xff]  ;;  %v1515_v55 = vpack.c.bf16 %v153_v46, %v152_v45  ;;  %v154_v59 = vld [vmem:[%s2693_s1 + $0x330] sm:$0xff] }
  0x3a   :  { %1464 = vmatpush3.bf16.msra.mxu0 %v1463_v52  ;;  %v202_v52 = vld [vmem:[%s2693_s1 + $0x4b0] sm:$0xff]  ;;  %v29_v56 = vld [vmem:[%s2695_s0 + $0x48] sm:$0xff]  ;;  %v1547_v57 = vpack.c.bf16 %v185_v49, %v184_v47  ;;  %v155_v60 = vld [vmem:[%s2693_s1 + $0x338] sm:$0xff] }
  0x3b   :  { %1496 = vmatpush3.bf16.msra.mxu1 %v1495_v53  ;;  %1466 = vmatprep.subr.bf16.mxu0 %v1465_v54  ;;  %v203_v53 = vld [vmem:[%s2693_s1 + $0x4b8] sm:$0xff]  ;;  %v186_v61 = vld [vmem:[%s2693_s1 + $0x430] sm:$0xff]  ;;  %v205_v3 = vld [vmem:[%s2693_s1 + $0x4c8] sm:$0xff]  ;;  %v1519_v4 = vpack.c.bf16 %v155_v60, %v154_v59 }
  0x3c   :  { %1498 = vmatprep.subr.bf16.mxu1 %v1497_v58  ;;  %v27_v54 = vld [vmem:[%s2695_s0 + $0x38] sm:$0xff]  ;;  %v1517_v58 = vpack.c.bf16 %v171_v51, %v170_v50  ;;  %v1549_v62 = vpack.c.bf16 %v203_v53, %v202_v52  ;;  %v156_v7 = vld [vmem:[%s2693_s1 + $0x340] sm:$0xff]  ;;  %v157_v8 = vld [vmem:[%s2693_s1 + $0x348] sm:$0xff] }
  0x3d   :  { %v187_v63 = vld [vmem:[%s2693_s1 + $0x438] sm:$0xff]  ;;  %v188_v9 = vld [vmem:[%s2693_s1 + $0x440] sm:$0xff]  ;;  %v189_v11 = vld [vmem:[%s2693_s1 + $0x448] sm:$0xff]  ;;  %v1523_v16 = vpack.c.bf16 %v157_v8, %v156_v7 }
  0x3e   :  { %1468 = vmatpush3.bf16.msra.mxu0 %v1467_v0  ;;  %v172_v0 = vld [vmem:[%s2693_s1 + $0x3c0] sm:$0xff]  ;;  %v1551_v5 = vpack.c.bf16 %v187_v63, %v186_v61  ;;  %v207_v15 = vld [vmem:[%s2693_s1 + $0x4d8] sm:$0xff]  ;;  %v158_v19 = vld [vmem:[%s2693_s1 + $0x350] sm:$0xff] }
  0x3f   :  { %1500 = vmatpush3.bf16.msra.mxu1 %v1499_v1  ;;  %1470 = vmatprep.subr.bf16.mxu0 %v1469_v2  ;;  %v173_v1 = vld [vmem:[%s2693_s1 + $0x3c8] sm:$0xff]  ;;  %v204_v2 = vld [vmem:[%s2693_s1 + $0x4c0] sm:$0xff]  ;;  %v159_v20 = vld [vmem:[%s2693_s1 + $0x358] sm:$0xff] }
  0x40   :  { %1502 = vmatprep.subr.bf16.mxu1 %v1501_v6  ;;  %v1521_v6 = vpack.c.bf16 %v173_v1, %v172_v0  ;;  %v1553_v10 = vpack.c.bf16 %v205_v3, %v204_v2  ;;  %v190_v21 = vld [vmem:[%s2693_s1 + $0x450] sm:$0xff]  ;;  %v191_v23 = vld [vmem:[%s2693_s1 + $0x458] sm:$0xff]  ;;  %v160_v31 = vld [vmem:[%s2693_s1 + $0x360] sm:$0xff] }
  0x41   :  { %v1559_v29 = vpack.c.bf16 %v191_v23, %v190_v21  ;;  %v193_v35 = vld [vmem:[%s2693_s1 + $0x468] sm:$0xff]  ;;  %v178_v36 = vld [vmem:[%s2693_s1 + $0x3f0] sm:$0xff]  ;;  %v179_v37 = vld [vmem:[%s2693_s1 + $0x3f8] sm:$0xff] }
  0x42   :  { %1472 = vmatpush3.bf16.msra.mxu0 %v1471_v12  ;;  %v174_v12 = vld [vmem:[%s2693_s1 + $0x3d0] sm:$0xff]  ;;  %v195_v47 = vld [vmem:[%s2693_s1 + $0x478] sm:$0xff]  ;;  %v229_v49 = vld [vmem:[%s2693_s1 + $0x588] sm:$0xff] }
  0x43   :  { %1504 = vmatpush3.bf16.msra.mxu1 %v1503_v13  ;;  %1506 = vmatprep.subr.bf16.mxu0 %v1505_v14  ;;  %v175_v13 = vld [vmem:[%s2693_s1 + $0x3d8] sm:$0xff]  ;;  %v206_v14 = vld [vmem:[%s2693_s1 + $0x4d0] sm:$0xff]  ;;  %v260_v50 = vld [vmem:[%s2693_s1 + $0x680] sm:$0xff] }
  0x44   :  { %1538 = vmatprep.subr.bf16.mxu1 %v1537_v17  ;;  %v1555_v17 = vpack.c.bf16 %v189_v11, %v188_v9  ;;  %v1525_v18 = vpack.c.bf16 %v175_v13, %v174_v12  ;;  %v1557_v22 = vpack.c.bf16 %v207_v15, %v206_v14  ;;  %v210_v38 = vld [vmem:[%s2693_s1 + $0x4f0] sm:$0xff]  ;;  %v261_v51 = vld [vmem:[%s2693_s1 + $0x688] sm:$0xff]  ;;  %v231_v61 = vld [vmem:[%s2693_s1 + $0x598] sm:$0xff] }
  0x45   :  { %559 = vmatmul.mubr.f32.vlgmr.msra.gmra.mrb[4].mxu0 %v22_v24  ;;  %v176_v24 = vld [vmem:[%s2693_s1 + $0x3e0] sm:$0xff]  ;;  %v194_v45 = vld [vmem:[%s2693_s1 + $0x470] sm:$0xff]  ;;  %v245_v59 = vld [vmem:[%s2693_s1 + $0x608] sm:$0xff] }
  0x46   :  { %634 = vmatmul.mubr.f32.vlgmr.msra.gmra.mrb[4].mxu1 %v24_v25  ;;  %1508 = vmatpush3.bf16.msra.mxu0 %v1507_v26  ;;  %v177_v25 = vld [vmem:[%s2693_s1 + $0x3e8] sm:$0xff]  ;;  %v208_v26 = vld [vmem:[%s2693_s1 + $0x4e0] sm:$0xff]  ;;  %v1567_v53 = vpack.c.bf16 %v195_v47, %v194_v45  ;;  %v230_v60 = vld [vmem:[%s2693_s1 + $0x590] sm:$0xff] }
  0x47   :  { %1540 = vmatpush3.bf16.msra.mxu1 %v1539_v28  ;;  %563 = vmatprep.mubr.f32.mxu0 %v39_v27  ;;  %v209_v27 = vld [vmem:[%s2693_s1 + $0x4e8] sm:$0xff]  ;;  %v1527_v28 = vpack.c.bf16 %v159_v20, %v158_v19  ;;  %v1529_v30 = vpack.c.bf16 %v177_v25, %v176_v24  ;;  %v263_v63 = vld [vmem:[%s2693_s1 + $0x698] sm:$0xff]  ;;  %v26_v0 = vld [vmem:[%s2695_s0 + $0x30] sm:$0xff]  ;;  %v1573_v8 = vpack.c.bf16 %v231_v61, %v230_v60 }
  0x48   :  { %1510 = vmatprep.subr.bf16.mxu0 %v1509_v32  ;;  %1542 = vmatprep.subr.bf16.mxu1 %v1541_v33  ;;  %v161_v32 = vld [vmem:[%s2693_s1 + $0x368] sm:$0xff]  ;;  %v192_v33 = vld [vmem:[%s2693_s1 + $0x460] sm:$0xff]  ;;  %v1561_v34 = vpack.c.bf16 %v209_v27, %v208_v26  ;;  %v43_v3 = vld [vmem:[%s2695_s0 + $0xb8] sm:$0xff] }
  0x49   :  { %564 = vmatmul.mubr.f32.gmra.mrb[6].mxu0 %v38_v39  ;;  %638 = vmatprep.mubr.f32.mxu1 %v41_v40  ;;  %v211_v39 = vld [vmem:[%s2693_s1 + $0x4f8] sm:$0xff]  ;;  %v1531_v40 = vpack.c.bf16 %v161_v32, %v160_v31  ;;  %v28_v1 = vld [vmem:[%s2695_s0 + $0x40] sm:$0xff]  ;;  %v246_v7 = vld [vmem:[%s2693_s1 + $0x610] sm:$0xff] }
  0x4a   :  { %1512 = vmatpush3.bf16.msra.mxu0 %v1511_v41  ;;  %639 = vmatmul.mubr.f32.gmra.mrb[6].mxu1 %v40_v42  ;;  %v1563_v41 = vpack.c.bf16 %v193_v35, %v192_v33  ;;  %v1533_v42 = vpack.c.bf16 %v179_v37, %v178_v36  ;;  %v1565_v46 = vpack.c.bf16 %v211_v39, %v210_v38  ;;  %v232_v11 = vld [vmem:[%s2693_s1 + $0x5a0] sm:$0xff]  ;;  %v233_v12 = vld [vmem:[%s2693_s1 + $0x5a8] sm:$0xff]  ;;  %v42_v15 = vld [vmem:[%s2695_s0 + $0xb0] sm:$0xff] }
  0x4b   :  { %1544 = vmatpush3.bf16.msra.mxu1 %v1543_v43  ;;  %1514 = vmatprep.subr.bf16.mxu0 %v1513_v44  ;;  %v162_v43 = vld [vmem:[%s2693_s1 + $0x370] sm:$0xff]  ;;  %v163_v44 = vld [vmem:[%s2693_s1 + $0x378] sm:$0xff]  ;;  %v264_v13 = vld [vmem:[%s2693_s1 + $0x6a0] sm:$0xff]  ;;  %v1577_v20 = vpack.c.bf16 %v233_v12, %v232_v11 }
  0x4c   :  { %1546 = vmatprep.subr.bf16.mxu1 %v1545_v48  ;;  %708 = vmatprep.mubr.f32.mxu0 %v27_v54  ;;  %v228_v48 = vld [vmem:[%s2693_s1 + $0x580] sm:$0xff]  ;;  %v1535_v52 = vpack.c.bf16 %v163_v44, %v162_v43  ;;  %v265_v14 = vld [vmem:[%s2693_s1 + $0x6a8] sm:$0xff]  ;;  %v234_v26 = vld [vmem:[%s2693_s1 + $0x5b0] sm:$0xff] }
  0x4d   :  { %783 = vmatprep.mubr.f32.mxu1 %v29_v56  ;;  %v1569_v54 = vpack.c.bf16 %v229_v49, %v228_v48  ;;  %v213_v56 = vld [vmem:[%s2693_s1 + $0x508] sm:$0xff]  ;;  %v216_v21 = vld [vmem:[%s2693_s1 + $0x520] sm:$0xff]  ;;  %v1609_v24 = vpack.c.bf16 %v265_v14, %v264_v13  ;;  %v235_v27 = vld [vmem:[%s2693_s1 + $0x5b8] sm:$0xff] }
  0x4e   :  { %1516 = vmatpush3.bf16.msra.mxu0 %v1515_v55  ;;  %v212_v55 = vld [vmem:[%s2693_s1 + $0x500] sm:$0xff]  ;;  %v249_v25 = vld [vmem:[%s2693_s1 + $0x628] sm:$0xff]  ;;  %v218_v35 = vld [vmem:[%s2693_s1 + $0x530] sm:$0xff] }
  0x4f   :  { %1548 = vmatpush3.bf16.msra.mxu1 %v1547_v57  ;;  %1518 = vmatprep.subr.bf16.mxu0 %v1517_v58  ;;  %v1601_v57 = vpack.c.bf16 %v261_v51, %v260_v50  ;;  %v244_v58 = vld [vmem:[%s2693_s1 + $0x600] sm:$0xff]  ;;  %v1571_v2 = vpack.c.bf16 %v213_v56, %v212_v55  ;;  %v33_v32 = vld [vmem:[%s2695_s0 + $0x68] sm:$0xff]  ;;  %v219_v36 = vld [vmem:[%s2693_s1 + $0x538] sm:$0xff] }
  0x50   :  { %1550 = vmatprep.subr.bf16.mxu1 %v1549_v62  ;;  %v262_v62 = vld [vmem:[%s2693_s1 + $0x690] sm:$0xff]  ;;  %v248_v23 = vld [vmem:[%s2693_s1 + $0x620] sm:$0xff]  ;;  %v251_v39 = vld [vmem:[%s2693_s1 + $0x638] sm:$0xff]  ;;  %v1583_v44 = vpack.c.bf16 %v219_v36, %v218_v35 }
  0x51   :  { %v1605_v9 = vpack.c.bf16 %v263_v63, %v262_v62  ;;  %v1611_v33 = vpack.c.bf16 %v249_v25, %v248_v23  ;;  %v250_v37 = vld [vmem:[%s2693_s1 + $0x630] sm:$0xff]  ;;  %v269_v43 = vld [vmem:[%s2693_s1 + $0x6c8] sm:$0xff]  ;;  %v220_v47 = vld [vmem:[%s2693_s1 + $0x540] sm:$0xff] }
  0x52   :  { %1520 = vmatpush3.bf16.msra.mxu0 %v1519_v4  ;;  %v1603_v4 = vpack.c.bf16 %v245_v59, %v244_v58  ;;  %v1615_v45 = vpack.c.bf16 %v251_v39, %v250_v37  ;;  %v221_v48 = vld [vmem:[%s2693_s1 + $0x548] sm:$0xff]  ;;  %v252_v49 = vld [vmem:[%s2693_s1 + $0x640] sm:$0xff]  ;;  %v271_v55 = vld [vmem:[%s2693_s1 + $0x6d8] sm:$0xff] }
  0x53   :  { %1552 = vmatpush3.bf16.msra.mxu1 %v1551_v5  ;;  %1522 = vmatprep.subr.bf16.mxu0 %v1521_v6  ;;  %v214_v5 = vld [vmem:[%s2693_s1 + $0x510] sm:$0xff]  ;;  %v215_v6 = vld [vmem:[%s2693_s1 + $0x518] sm:$0xff]  ;;  %v253_v51 = vld [vmem:[%s2693_s1 + $0x648] sm:$0xff]  ;;  %v1587_v56 = vpack.c.bf16 %v221_v48, %v220_v47 }
  0x54   :  { %1554 = vmatprep.subr.bf16.mxu1 %v1553_v10  ;;  %v247_v10 = vld [vmem:[%s2693_s1 + $0x618] sm:$0xff]  ;;  %v222_v59 = vld [vmem:[%s2693_s1 + $0x550] sm:$0xff]  ;;  %v257_v11 = vld [vmem:[%s2693_s1 + $0x668] sm:$0xff] }
  0x55   :  { %v1607_v19 = vpack.c.bf16 %v247_v10, %v246_v7  ;;  %v223_v60 = vld [vmem:[%s2693_s1 + $0x558] sm:$0xff]  ;;  %v254_v61 = vld [vmem:[%s2693_s1 + $0x650] sm:$0xff]  ;;  %v224_v7 = vld [vmem:[%s2693_s1 + $0x560] sm:$0xff] }
  0x56   :  { %1524 = vmatpush3.bf16.msra.mxu0 %v1523_v16  ;;  %v45_v16 = vld [vmem:[%s2695_s0 + $0xc8] sm:$0xff]  ;;  %v255_v63 = vld [vmem:[%s2693_s1 + $0x658] sm:$0xff]  ;;  %v242_v12 = vld [vmem:[%s2693_s1 + $0x5f0] sm:$0xff] }
  0x57   :  { %1556 = vmatpush3.bf16.msra.mxu1 %v1555_v17  ;;  %1526 = vmatprep.subr.bf16.mxu0 %v1525_v18  ;;  %v1575_v17 = vpack.c.bf16 %v215_v6, %v214_v5  ;;  %v44_v18 = vld [vmem:[%s2695_s0 + $0xc0] sm:$0xff]  ;;  %v1623_v5 = vpack.c.bf16 %v255_v63, %v254_v61  ;;  %v243_v13 = vld [vmem:[%s2693_s1 + $0x5f8] sm:$0xff]  ;;  %v274_v14 = vld [vmem:[%s2693_s1 + $0x6f0] sm:$0xff] }
  0x58   :  { %1558 = vmatprep.subr.bf16.mxu1 %v1557_v22  ;;  %v217_v22 = vld [vmem:[%s2693_s1 + $0x528] sm:$0xff]  ;;  %v259_v23 = vld [vmem:[%s2693_s1 + $0x678] sm:$0xff]  ;;  %v32_v35 = vld [vmem:[%s2695_s0 + $0x60] sm:$0xff] }
  0x59   :  { %v1579_v31 = vpack.c.bf16 %v217_v22, %v216_v21  ;;  %v258_v21 = vld [vmem:[%s2693_s1 + $0x670] sm:$0xff]  ;;  %v293_v25 = vld [vmem:[%s2693_s1 + $0x788] sm:$0xff]  ;;  %v279_v37 = vld [vmem:[%s2693_s1 + $0x718] sm:$0xff] }
  0x5a   :  { %1528 = vmatpush3.bf16.msra.mxu0 %v1527_v28  ;;  %v266_v28 = vld [vmem:[%s2693_s1 + $0x6b0] sm:$0xff]  ;;  %v280_v47 = vld [vmem:[%s2693_s1 + $0x720] sm:$0xff]  ;;  %v281_v48 = vld [vmem:[%s2693_s1 + $0x728] sm:$0xff] }
  0x5b   :  { %1560 = vmatpush3.bf16.msra.mxu1 %v1559_v29  ;;  %1530 = vmatprep.subr.bf16.mxu0 %v1529_v30  ;;  %v267_v29 = vld [vmem:[%s2693_s1 + $0x6b8] sm:$0xff]  ;;  %v278_v36 = vld [vmem:[%s2693_s1 + $0x710] sm:$0xff]  ;;  %v284_v61 = vld [vmem:[%s2693_s1 + $0x740] sm:$0xff] }
  0x5c   :  { %1562 = vmatprep.subr.bf16.mxu1 %v1561_v34  ;;  %v31_v30 = vld [vmem:[%s2695_s0 + $0x58] sm:$0xff]  ;;  %v1581_v34 = vpack.c.bf16 %v235_v27, %v234_v26  ;;  %v1613_v38 = vpack.c.bf16 %v267_v29, %v266_v28  ;;  %v1631_v27 = vpack.c.bf16 %v259_v23, %v258_v21  ;;  %v276_v29 = vld [vmem:[%s2693_s1 + $0x700] sm:$0xff]  ;;  %v302_v63 = vld [vmem:[%s2693_s1 + $0x7d0] sm:$0xff] }
  0x5e   :  { %1532 = vmatpush3.bf16.msra.mxu0 %v1531_v40  ;;  %v236_v40 = vld [vmem:[%s2693_s1 + $0x5c0] sm:$0xff] }
  0x5f   :  { %1564 = vmatpush3.bf16.msra.mxu1 %v1563_v41  ;;  %1534 = vmatprep.subr.bf16.mxu0 %v1533_v42  ;;  %v237_v41 = vld [vmem:[%s2693_s1 + $0x5c8] sm:$0xff]  ;;  %v268_v42 = vld [vmem:[%s2693_s1 + $0x6c0] sm:$0xff] }
  0x60   :  { %1566 = vmatprep.subr.bf16.mxu1 %v1565_v46  ;;  %v1585_v46 = vpack.c.bf16 %v237_v41, %v236_v40  ;;  %v1617_v50 = vpack.c.bf16 %v269_v43, %v268_v42  ;;  %v296_v40 = vld [vmem:[%s2693_s1 + $0x7a0] sm:$0xff]  ;;  %v297_v41 = vld [vmem:[%s2693_s1 + $0x7a8] sm:$0xff]  ;;  %v46_v42 = vld [vmem:[%s2695_s0 + $0xd0] sm:$0xff] }
  0x61   :  { %v49_v43 = vld [vmem:[%s2695_s0 + $0xe8] sm:$0xff] }
  0x62   :  { %1536 = vmatpush3.bf16.msra.mxu0 %v1535_v52  ;;  %v238_v52 = vld [vmem:[%s2693_s1 + $0x5d0] sm:$0xff] }
  0x63   :  { %1568 = vmatpush3.bf16.msra.mxu1 %v1567_v53  ;;  %1570 = vmatprep.subr.bf16.mxu0 %v1569_v54  ;;  %v239_v53 = vld [vmem:[%s2693_s1 + $0x5d8] sm:$0xff]  ;;  %v270_v54 = vld [vmem:[%s2693_s1 + $0x6d0] sm:$0xff] }
  0x64   :  { %1602 = vmatprep.subr.bf16.mxu1 %v1601_v57  ;;  %v1619_v57 = vpack.c.bf16 %v253_v51, %v252_v49  ;;  %v1589_v58 = vpack.c.bf16 %v239_v53, %v238_v52  ;;  %v1621_v62 = vpack.c.bf16 %v271_v55, %v270_v54  ;;  %v298_v49 = vld [vmem:[%s2693_s1 + $0x7b0] sm:$0xff]  ;;  %v35_v51 = vld [vmem:[%s2695_s0 + $0x78] sm:$0xff]  ;;  %v1643_v52 = vpack.c.bf16 %v281_v48, %v280_v47 }
  0x65   :  { %709 = vmatmul.mubr.f32.vlgmr.msra.gmra.mrb[8].mxu0 %v26_v0  ;;  %v240_v0 = vld [vmem:[%s2693_s1 + $0x5e0] sm:$0xff]  ;;  %v51_v53 = vld [vmem:[%s2695_s0 + $0xf8] sm:$0xff]  ;;  %v282_v55 = vld [vmem:[%s2693_s1 + $0x730] sm:$0xff] }
  0x66   :  { %784 = vmatmul.mubr.f32.vlgmr.msra.gmra.mrb[8].mxu1 %v28_v1  ;;  %1572 = vmatpush3.bf16.msra.mxu0 %v1571_v2  ;;  %v241_v1 = vld [vmem:[%s2693_s1 + $0x5e8] sm:$0xff]  ;;  %v272_v2 = vld [vmem:[%s2693_s1 + $0x6e0] sm:$0xff] }
  0x67   :  { %1604 = vmatpush3.bf16.msra.mxu1 %v1603_v4  ;;  %713 = vmatprep.mubr.f32.mxu0 %v43_v3  ;;  %v273_v3 = vld [vmem:[%s2693_s1 + $0x6e8] sm:$0xff]  ;;  %v1591_v4 = vpack.c.bf16 %v223_v60, %v222_v59  ;;  %v1593_v6 = vpack.c.bf16 %v241_v1, %v240_v0  ;;  %v303_v0 = vld [vmem:[%s2693_s1 + $0x7d8] sm:$0xff] }
  0x68   :  { %1574 = vmatprep.subr.bf16.mxu0 %v1573_v8  ;;  %1606 = vmatprep.subr.bf16.mxu1 %v1605_v9  ;;  %v225_v8 = vld [vmem:[%s2693_s1 + $0x568] sm:$0xff]  ;;  %v256_v9 = vld [vmem:[%s2693_s1 + $0x660] sm:$0xff]  ;;  %v1625_v10 = vpack.c.bf16 %v273_v3, %v272_v2  ;;  %v1653_v2 = vpack.c.bf16 %v303_v0, %v302_v63  ;;  %v286_v3 = vld [vmem:[%s2693_s1 + $0x750] sm:$0xff] }
  0x69   :  { %714 = vmatmul.mubr.f32.gmra.mrb[10].mxu0 %v42_v15  ;;  %788 = vmatprep.mubr.f32.mxu1 %v45_v16  ;;  %v275_v15 = vld [vmem:[%s2693_s1 + $0x6f8] sm:$0xff]  ;;  %v1595_v16 = vpack.c.bf16 %v225_v8, %v224_v7 }
  0x6a   :  { %1576 = vmatpush3.bf16.msra.mxu0 %v1575_v17  ;;  %789 = vmatmul.mubr.f32.gmra.mrb[10].mxu1 %v44_v18  ;;  %v1627_v17 = vpack.c.bf16 %v257_v11, %v256_v9  ;;  %v1597_v18 = vpack.c.bf16 %v243_v13, %v242_v12  ;;  %v1629_v22 = vpack.c.bf16 %v275_v15, %v274_v14  ;;  %v288_v9 = vld [vmem:[%s2693_s1 + $0x760] sm:$0xff]  ;;  %v306_v11 = vld [vmem:[%s2693_s1 + $0x7f0] sm:$0xff]  ;;  %v307_v12 = vld [vmem:[%s2693_s1 + $0x7f8] sm:$0xff] }
  0x6b   :  { %1608 = vmatpush3.bf16.msra.mxu1 %v1607_v19  ;;  %1578 = vmatprep.subr.bf16.mxu0 %v1577_v20  ;;  %v226_v19 = vld [vmem:[%s2693_s1 + $0x570] sm:$0xff]  ;;  %v227_v20 = vld [vmem:[%s2693_s1 + $0x578] sm:$0xff]  ;;  %v1661_v14 = vpack.c.bf16 %v307_v12, %v306_v11 }
  0x6c   :  { %1610 = vmatprep.subr.bf16.mxu1 %v1609_v24  ;;  %858 = vmatprep.mubr.f32.mxu0 %v31_v30  ;;  %v292_v24 = vld [vmem:[%s2693_s1 + $0x780] sm:$0xff]  ;;  %v1599_v26 = vpack.c.bf16 %v227_v20, %v226_v19  ;;  %v277_v30 = vld [vmem:[%s2693_s1 + $0x708] sm:$0xff]  ;;  %v290_v15 = vld [vmem:[%s2693_s1 + $0x770] sm:$0xff] }
  0x6d   :  { %933 = vmatprep.mubr.f32.mxu1 %v33_v32  ;;  %v1633_v28 = vpack.c.bf16 %v293_v25, %v292_v24  ;;  %v295_v32 = vld [vmem:[%s2693_s1 + $0x798] sm:$0xff]  ;;  %v50_v19 = vld [vmem:[%s2695_s0 + $0xf0] sm:$0xff] }
  0x6e   :  { %1580 = vmatpush3.bf16.msra.mxu0 %v1579_v31  ;;  %v294_v31 = vld [vmem:[%s2693_s1 + $0x790] sm:$0xff] }
  0x6f   :  { %1612 = vmatpush3.bf16.msra.mxu1 %v1611_v33  ;;  %1582 = vmatprep.subr.bf16.mxu0 %v1581_v34  ;;  %v30_v33 = vld [vmem:[%s2695_s0 + $0x50] sm:$0xff]  ;;  %v1635_v34 = vpack.c.bf16 %v277_v30, %v276_v29  ;;  %v1637_v39 = vpack.c.bf16 %v295_v32, %v294_v31 }
  0x70   :  { %1614 = vmatprep.subr.bf16.mxu1 %v1613_v38  ;;  %v47_v38 = vld [vmem:[%s2695_s0 + $0xd8] sm:$0xff] }
  0x72   :  { %1584 = vmatpush3.bf16.msra.mxu0 %v1583_v44  ;;  %v1639_v44 = vpack.c.bf16 %v279_v37, %v278_v36 }
  0x73   :  { %1616 = vmatpush3.bf16.msra.mxu1 %v1615_v45  ;;  %1586 = vmatprep.subr.bf16.mxu0 %v1585_v46  ;;  %v48_v45 = vld [vmem:[%s2695_s0 + $0xe0] sm:$0xff]  ;;  %v1641_v46 = vpack.c.bf16 %v297_v41, %v296_v40 }
  0x74   :  { %1618 = vmatprep.subr.bf16.mxu1 %v1617_v50  ;;  %v299_v50 = vld [vmem:[%s2693_s1 + $0x7b8] sm:$0xff] }
  0x75   :  { %v1645_v54 = vpack.c.bf16 %v299_v50, %v298_v49 }
  0x76   :  { %1588 = vmatpush3.bf16.msra.mxu0 %v1587_v56  ;;  %v283_v56 = vld [vmem:[%s2693_s1 + $0x738] sm:$0xff] }
  0x77   :  { %1620 = vmatpush3.bf16.msra.mxu1 %v1619_v57  ;;  %1590 = vmatprep.subr.bf16.mxu0 %v1589_v58  ;;  %v300_v57 = vld [vmem:[%s2693_s1 + $0x7c0] sm:$0xff]  ;;  %v301_v58 = vld [vmem:[%s2693_s1 + $0x7c8] sm:$0xff]  ;;  %v1647_v59 = vpack.c.bf16 %v283_v56, %v282_v55 }
  0x78   :  { %1622 = vmatprep.subr.bf16.mxu1 %v1621_v62  ;;  %v1649_v60 = vpack.c.bf16 %v301_v58, %v300_v57  ;;  %v285_v62 = vld [vmem:[%s2693_s1 + $0x748] sm:$0xff] }
  0x79   :  { %v1651_v1 = vpack.c.bf16 %v285_v62, %v284_v61 }
  0x7a   :  { %1592 = vmatpush3.bf16.msra.mxu0 %v1591_v4  ;;  %v287_v4 = vld [vmem:[%s2693_s1 + $0x758] sm:$0xff] }
  0x7b   :  { %1624 = vmatpush3.bf16.msra.mxu1 %v1623_v5  ;;  %1594 = vmatprep.subr.bf16.mxu0 %v1593_v6  ;;  %v304_v5 = vld [vmem:[%s2693_s1 + $0x7e0] sm:$0xff]  ;;  %v305_v6 = vld [vmem:[%s2693_s1 + $0x7e8] sm:$0xff]  ;;  %v1655_v7 = vpack.c.bf16 %v287_v4, %v286_v3 }
  0x7c   :  { %1626 = vmatprep.subr.bf16.mxu1 %v1625_v10  ;;  %v1657_v8 = vpack.c.bf16 %v305_v6, %v304_v5  ;;  %v289_v10 = vld [vmem:[%s2693_s1 + $0x768] sm:$0xff] }
  0x7d   :  { %v1659_v13 = vpack.c.bf16 %v289_v10, %v288_v9 }
  0x7e   :  { %1596 = vmatpush3.bf16.msra.mxu0 %v1595_v16  ;;  %v291_v16 = vld [vmem:[%s2693_s1 + $0x778] sm:$0xff] }
  0x7f   :  { %1628 = vmatpush3.bf16.msra.mxu1 %v1627_v17  ;;  %1598 = vmatprep.subr.bf16.mxu0 %v1597_v18  ;;  %v1663_v17 = vpack.c.bf16 %v291_v16, %v290_v15  ;;  %v34_v18 = vld [vmem:[%s2695_s0 + $0x70] sm:$0xff] }
  0x80   :  { %1630 = vmatprep.subr.bf16.mxu1 %v1629_v22 }
  0x82   :  { %1600 = vmatpush3.bf16.msra.mxu0 %v1599_v26 }
  0x83   :  { %1632 = vmatpush3.bf16.msra.mxu1 %v1631_v27  ;;  %1634 = vmatprep.subr.bf16.mxu0 %v1633_v28 }
  0x84   :  { %1665 = vmatprep.subr.bf16.mxu1 %v1633_v28 }
  0x85   :  { %859 = vmatmul.mubr.f32.vlgmr.msra.gmra.mrb[12].mxu0 %v30_v33 }
  0x86   :  { %934 = vmatmul.mubr.f32.vlgmr.msra.gmra.mrb[12].mxu1 %v32_v35  ;;  %1636 = vmatpush3.bf16.msra.mxu0 %v1635_v34 }
  0x87   :  { %1673 = vmatpush3.bf16.msra.mxu1 %v1635_v34  ;;  %863 = vmatprep.mubr.f32.mxu0 %v47_v38 }
  0x88   :  { %1638 = vmatprep.subr.bf16.mxu0 %v1637_v39  ;;  %1666 = vmatprep.subr.bf16.mxu1 %v1637_v39 }
  0x89   :  { %864 = vmatmul.mubr.f32.gmra.mrb[14].mxu0 %v46_v42  ;;  %938 = vmatprep.mubr.f32.mxu1 %v49_v43 }
  0x8a   :  { %1640 = vmatpush3.bf16.msra.mxu0 %v1639_v44  ;;  %939 = vmatmul.mubr.f32.gmra.mrb[14].mxu1 %v48_v45 }
  0x8b   :  { %1674 = vmatpush3.bf16.msra.mxu1 %v1639_v44  ;;  %1642 = vmatprep.subr.bf16.mxu0 %v1641_v46 }
  0x8c   :  { %1667 = vmatprep.subr.bf16.mxu1 %v1641_v46  ;;  %1008 = vmatprep.mubr.f32.mxu0 %v35_v51 }
  0x8d   :  { %1013 = vmatprep.mubr.f32.mxu1 %v51_v53 }
  0x8e   :  { %1644 = vmatpush3.bf16.msra.mxu0 %v1643_v52 }
  0x8f   :  { %1675 = vmatpush3.bf16.msra.mxu1 %v1643_v52  ;;  %1646 = vmatprep.subr.bf16.mxu0 %v1645_v54 }
  0x90   :  { %1668 = vmatprep.subr.bf16.mxu1 %v1645_v54 }
  0x92   :  { %1648 = vmatpush3.bf16.msra.mxu0 %v1647_v59 }
  0x93   :  { %1676 = vmatpush3.bf16.msra.mxu1 %v1647_v59  ;;  %1650 = vmatprep.subr.bf16.mxu0 %v1649_v60 }
  0x94   :  { %1669 = vmatprep.subr.bf16.mxu1 %v1649_v60 }
  0x96   :  { %1652 = vmatpush3.bf16.msra.mxu0 %v1651_v1 }
  0x97   :  { %1677 = vmatpush3.bf16.msra.mxu1 %v1651_v1  ;;  %1654 = vmatprep.subr.bf16.mxu0 %v1653_v2 }
  0x98   :  { %1670 = vmatprep.subr.bf16.mxu1 %v1653_v2 }
  0x9a   :  { %1656 = vmatpush3.bf16.msra.mxu0 %v1655_v7 }
  0x9b   :  { %1678 = vmatpush3.bf16.msra.mxu1 %v1655_v7  ;;  %1658 = vmatprep.subr.bf16.mxu0 %v1657_v8 }
  0x9c   :  { %1671 = vmatprep.subr.bf16.mxu1 %v1657_v8 }
  0x9e   :  { %1660 = vmatpush3.bf16.msra.mxu0 %v1659_v13 }
  0x9f   :  { %1679 = vmatpush3.bf16.msra.mxu1 %v1659_v13  ;;  %1662 = vmatprep.subr.bf16.mxu0 %v1661_v14 }
  0xa0   :  { %1672 = vmatprep.subr.bf16.mxu1 %v1661_v14 }
  0xa2   :  { %1664 = vmatpush3.bf16.msra.mxu0 %v1663_v17 }
  0xa3   :  { %1680 = vmatpush3.bf16.msra.mxu1 %v1663_v17 }
  0xa5   :  { %1009 = vmatmul.mubr.f32.vlgmr.msra.gmra.mrb[16].mxu0 %v34_v18 }
  0xa6   :  { %1014 = vmatmul.mubr.f32.vlgmr.msra.gmra.mrb[16].mxu1 %v50_v19 }
  0xf8   :  { %v1067_v20 = vpop.f32.mrb[0].mxu0 }
  0xf9   :  { %v1105_v21 = vpop.f32.mrb[0].mxu1  ;;  %v1068_v22 = vpop.f32.mrb[1].mxu0 }
  0xfa   :  { %v1069_v23 = vadd.f32 %v1068_v22, %v1067_v20  ;;  %v1106_v24 = vpop.f32.mrb[1].mxu1 }
  0xfb   :  { %v1107_v25 = vadd.f32 %v1106_v24, %v1105_v21 }
  0xfc   :  { %v1070_v27 = vpop.f32.mrb[2].mxu0 }
  0xfd   :  { %v486_v26 = vadd.f32 %v1107_v25, %v1069_v23  ;;  %v1108_v28 = vpop.f32.mrb[2].mxu1  ;;  %v1071_v29 = vpop.f32.mrb[3].mxu0  ;;  %v1034_v23 = vld [vmem:[%s2696_s4] ss:$0 sm:$0xff] }
  0xfe   :  { %v1072_v30 = vadd.f32 %v1071_v29, %v1070_v27  ;;  %v1109_v31 = vpop.f32.mrb[3].mxu1 }
  0xff   :  { %v1110_v32 = vadd.f32 %v1109_v31, %v1108_v28 }
 0x101   :  { %v491_v33 = vadd.f32 %v1110_v32, %v1072_v30 }
 0x118   :  { %v1143_v34 = vpop.f32.mrb[4].mxu0 }
 0x119   :  { %v1181_v35 = vpop.f32.mrb[4].mxu1  ;;  %v1144_v36 = vpop.f32.mrb[5].mxu0 }
 0x11a   :  { %v1145_v37 = vadd.f32 %v1144_v36, %v1143_v34  ;;  %v1182_v38 = vpop.f32.mrb[5].mxu1 }
 0x11b   :  { %v1183_v39 = vadd.f32 %v1182_v38, %v1181_v35 }
 0x11c   :  { %v561_v40 = vadd.f32 %v1145_v37, %v486_v26  ;;  %v1146_v41 = vpop.f32.mrb[6].mxu0 }
 0x11d   :  { %v1147_v42 = vpop.f32.mrb[7].mxu0  ;;  %v1184_v43 = vpop.f32.mrb[6].mxu1 }
 0x11e   :  { %v636_v44 = vadd.f32 %v1183_v39, %v561_v40  ;;  %v1148_v45 = vadd.f32 %v1147_v42, %v1146_v41  ;;  %v1185_v46 = vpop.f32.mrb[7].mxu1 }
 0x11f   :  { %v1186_v47 = vadd.f32 %v1185_v46, %v1184_v43 }
 0x120   :  { %v566_v48 = vadd.f32 %v1148_v45, %v491_v33 }
 0x122   :  { %v641_v49 = vadd.f32 %v1186_v47, %v566_v48 }
 0x138   :  { %v1219_v50 = vpop.f32.mrb[8].mxu0 }
 0x139   :  { %v1257_v51 = vpop.f32.mrb[8].mxu1  ;;  %v1220_v52 = vpop.f32.mrb[9].mxu0 }
 0x13a   :  { %v1221_v53 = vadd.f32 %v1220_v52, %v1219_v50  ;;  %v1258_v54 = vpop.f32.mrb[9].mxu1 }
 0x13b   :  { %v1259_v55 = vadd.f32 %v1258_v54, %v1257_v51 }
 0x13c   :  { %v711_v56 = vadd.f32 %v1221_v53, %v636_v44  ;;  %v1222_v57 = vpop.f32.mrb[10].mxu0 }
 0x13d   :  { %v1223_v58 = vpop.f32.mrb[11].mxu0  ;;  %v1260_v59 = vpop.f32.mrb[10].mxu1 }
 0x13e   :  { %v786_v60 = vadd.f32 %v1259_v55, %v711_v56  ;;  %v1224_v61 = vadd.f32 %v1223_v58, %v1222_v57  ;;  %v1261_v62 = vpop.f32.mrb[11].mxu1 }
 0x13f   :  { %v1262_v63 = vadd.f32 %v1261_v62, %v1260_v59 }
 0x140   :  { %v716_v0 = vadd.f32 %v1224_v61, %v641_v49 }
 0x142   :  { %v791_v1 = vadd.f32 %v1262_v63, %v716_v0 }
 0x158   :  { %v1295_v2 = vpop.f32.mrb[12].mxu0 }
 0x159   :  { %v1333_v3 = vpop.f32.mrb[12].mxu1  ;;  %v1296_v4 = vpop.f32.mrb[13].mxu0 }
 0x15a   :  { %v1297_v5 = vadd.f32 %v1296_v4, %v1295_v2  ;;  %v1334_v6 = vpop.f32.mrb[13].mxu1 }
 0x15b   :  { %v1335_v7 = vadd.f32 %v1334_v6, %v1333_v3 }
 0x15c   :  { %v861_v8 = vadd.f32 %v1297_v5, %v786_v60  ;;  %v1298_v9 = vpop.f32.mrb[14].mxu0 }
 0x15d   :  { %v1299_v10 = vpop.f32.mrb[15].mxu0  ;;  %v1336_v11 = vpop.f32.mrb[14].mxu1 }
 0x15e   :  { %v936_v12 = vadd.f32 %v1335_v7, %v861_v8  ;;  %v1300_v13 = vadd.f32 %v1299_v10, %v1298_v9  ;;  %v1337_v14 = vpop.f32.mrb[15].mxu1 }
 0x15f   :  { %v1338_v15 = vadd.f32 %v1337_v14, %v1336_v11 }
 0x160   :  { %v866_v16 = vadd.f32 %v1300_v13, %v791_v1 }
 0x162   :  { %v941_v17 = vadd.f32 %v1338_v15, %v866_v16 }
 0x178   :  { %v1371_v18 = vpop.f32.mrb[16].mxu0 }
 0x179   :  { %v1374_v19 = vpop.f32.mrb[16].mxu1  ;;  %v1372_v20 = vpop.f32.mrb[17].mxu0 }
 0x17a   :  { %v1373_v21 = vadd.f32 %v1372_v20, %v1371_v18  ;;  %v1375_v22 = vpop.f32.mrb[17].mxu1 }
 0x17b   :  { %v1376_v24 = vadd.f32 %v1375_v22, %v1374_v19 }
 0x17c   :  { %v1011_v25 = vadd.f32 %v1373_v21, %v936_v12 }
 0x17d   :  { %v1016_v26 = vadd.f32 %v1376_v24, %v941_v17 }
 0x17e   :  { %v1026_v27 = vadd.f32 %v1034_v23, %v1011_v25 }
 0x17f   :  { %v1027_v28 = vadd.f32 %v1034_v23, %v1016_v26 }
 0x180   :  { %1028 = vst [vmem:[%s2697_s5] sm:$0xff] %v1026_v27 }
 0x181   :  { %1029 = vst [vmem:[%s2697_s5 + $0x8] sm:$0xff] %v1027_v28 }

</bundles_post_ra>
